<compile_context>
chip_gen: v7x
topology: tpu7x:2x2x1
jax: 0.10.0
libtpu: 0.0.40
codegen_flags: <defaults>
</compile_context>

<pallas_src>
import jax
import jax.numpy as jnp
from jax.experimental import pallas as pl
from jax.experimental.pallas import tpu as pltpu


def _sigmoid(x):
    return 1.0 / (1.0 + jnp.exp(-x))


def _bilstm_layer_kernel(x_ref, mask_ref,
                         wi_f_ref, wh_f_ref, b_f_ref,
                         wi_b_ref, wh_b_ref, b_b_ref,
                         out_f_ref, out_b_ref,
                         xgf_sc, xgb_sc, hf_sc, cf_sc, hb_sc, cb_sc):
    """One bidirectional LSTM layer over a time-major (L, B, F) sequence.

    Weight layout (transposed from torch): W_ih -> (F, 4H), W_hh -> (H, 4H),
    bias -> (1, 4H) with PyTorch gate order [i, f, g, o].
    """
    L, B, F = x_ref.shape
    H4 = wh_f_ref.shape[1]
    H = H4 // 4

    # Batched input->gate projections for all (t, b) at once: two lane-dense
    # MXU matmuls (biases folded in), stored to VMEM scratch for the time loop.
    x2d = x_ref[...].reshape(L * B, F)
    xgf_sc[...] = (jnp.dot(x2d, wi_f_ref[...],
                           preferred_element_type=jnp.float32)
                   + b_f_ref[...]).reshape(L, B, H4)
    xgb_sc[...] = (jnp.dot(x2d, wi_b_ref[...],
                           preferred_element_type=jnp.float32)
                   + b_b_ref[...]).reshape(L, B, H4)

    wh_f = wh_f_ref[...]
    wh_b = wh_b_ref[...]

    def lstm_cell(xg, h, c, wh):
        g = xg + jnp.dot(h, wh, preferred_element_type=jnp.float32)
        i = _sigmoid(g[:, 0 * H:1 * H])
        f = _sigmoid(g[:, 1 * H:2 * H])
        gg = jnp.tanh(g[:, 2 * H:3 * H])
        o = _sigmoid(g[:, 3 * H:4 * H])
        c_new = f * c + i * gg
        h_new = o * jnp.tanh(c_new)
        return h_new, c_new

    # ---- forward direction ---------------------------------------------------
    hf_sc[...] = jnp.zeros_like(hf_sc)
    cf_sc[...] = jnp.zeros_like(cf_sc)

    def fwd_step(t, carry):
        m = mask_ref[t]                                        # (B, 1)
        h_new, c_new = lstm_cell(xgf_sc[t], hf_sc[...], cf_sc[...], wh_f)
        h_out = m * h_new                                      # zeros at padding
        hf_sc[...] = h_out + (1.0 - m) * hf_sc[...]
        cf_sc[...] = m * c_new + (1.0 - m) * cf_sc[...]
        out_f_ref[t] = h_out
        return carry

    jax.lax.fori_loop(0, L, fwd_step, 0)

    # ---- reverse direction (packed semantics: starts at t = length - 1) ------
    hb_sc[...] = jnp.zeros_like(hb_sc)
    cb_sc[...] = jnp.zeros_like(cb_sc)

    def bwd_step(s, carry):
        t = L - 1 - s
        m = mask_ref[t]
        h_new, c_new = lstm_cell(xgb_sc[t], hb_sc[...], cb_sc[...], wh_b)
        h_out = m * h_new
        hb_sc[...] = h_out + (1.0 - m) * hb_sc[...]             # stays 0 past length
        cb_sc[...] = m * c_new + (1.0 - m) * cb_sc[...]
        out_b_ref[t] = h_out
        return carry

    jax.lax.fori_loop(0, L, bwd_step, 0)


def _double_maxout_kernel(h1_ref, h2_ref,
                          w1a_ref, b1a_ref, w1b_ref, b1b_ref,
                          w2a_ref, b2a_ref, w2b_ref, b2b_ref,
                          o1_ref, o2_ref):
    """Both MaxOut heads fused: o_k = max(h_k @ Wa_k + ba_k, h_k @ Wb_k + bb_k)."""
    L, B, F = h1_ref.shape
    H = w1a_ref.shape[1]

    x1 = h1_ref[...].reshape(L * B, F)
    x2 = h2_ref[...].reshape(L * B, F)

    a = jnp.dot(x1, w1a_ref[...], preferred_element_type=jnp.float32) + b1a_ref[...]
    b = jnp.dot(x1, w1b_ref[...], preferred_element_type=jnp.float32) + b1b_ref[...]
    o1_ref[...] = jnp.maximum(a, b).reshape(L, B, H)

    c = jnp.dot(x2, w2a_ref[...], preferred_element_type=jnp.float32) + b2a_ref[...]
    d = jnp.dot(x2, w2b_ref[...], preferred_element_type=jnp.float32) + b2b_ref[...]
    o2_ref[...] = jnp.maximum(c, d).reshape(L, B, H)


def _bilstm_layer(x, mask, lp):
    """x: (L, B, F) time-major, mask: (L, B, 1). Returns (L, B, 2H)."""
    L, B, F = x.shape
    H4 = lp["wh_f"].shape[1]
    H = H4 // 4

    out_f, out_b = pl.pallas_call(
        _bilstm_layer_kernel,
        out_shape=(jax.ShapeDtypeStruct((L, B, H), jnp.float32),
                   jax.ShapeDtypeStruct((L, B, H), jnp.float32)),
        scratch_shapes=[
            pltpu.VMEM((L, B, H4), jnp.float32),   # fwd input projections
            pltpu.VMEM((L, B, H4), jnp.float32),   # bwd input projections
            pltpu.VMEM((B, H), jnp.float32),       # h fwd
            pltpu.VMEM((B, H), jnp.float32),       # c fwd
            pltpu.VMEM((B, H), jnp.float32),       # h bwd
            pltpu.VMEM((B, H), jnp.float32),       # c bwd
        ],
    )(x, mask,
      lp["wi_f"], lp["wh_f"], lp["b_f"],
      lp["wi_b"], lp["wh_b"], lp["b_b"])

    return jnp.concatenate([out_f, out_b], axis=-1)            # (L, B, 2H)


def _double_maxout(h1, h2, p1, p2):
    L, B, _ = h1.shape
    H = p1["wa"].shape[1]
    return pl.pallas_call(
        _double_maxout_kernel,
        out_shape=(jax.ShapeDtypeStruct((L, B, H), jnp.float32),
                   jax.ShapeDtypeStruct((L, B, H), jnp.float32)),
    )(h1, h2,
      p1["wa"], p1["ba"], p1["wb"], p1["bb"],
      p2["wa"], p2["ba"], p2["wb"], p2["bb"])


def contextual_encoder_forward(fmap, length, params):
    """ContextualEncoder.forward((fmap, fmap_length)).

    fmap   : (B, C, L)  -- NCL layout, as fed to the PyTorch module (Linker permutes)
    length : (B,) int   -- valid sequence lengths (concrete array, not traced)
    returns (contextual_fmap (B, Lmax, 2H), length)
    """
    B, C, L = fmap.shape

    # Linker: (B, C, L) -> (B, L, C); kernels work time-major (L, B, C).
    x = jnp.transpose(fmap, (2, 0, 1)).astype(jnp.float32)

    # packed-sequence validity mask: mask[t, b] = 1.0 iff t < length[b]
    mask = (jnp.arange(L)[:, None] < length[None, :]).astype(jnp.float32)
    mask = mask[:, :, None]                                    # (L, B, 1)

    # _ops_1 : 2-layer bidirectional LSTM over the packed input
    h = _bilstm_layer(x, mask, params["lstm1_l1"])
    outputs_1 = _bilstm_layer(h, mask, params["lstm1_l2"])     # (L, B, 2H)

    # _ops_2 : 2-layer bidirectional LSTM over packed outputs_1
    h = _bilstm_layer(outputs_1, mask, params["lstm2_l1"])
    outputs_2 = _bilstm_layer(h, mask, params["lstm2_l2"])     # (L, B, 2H)

    # _act_1 / _act_2 : MaxOut on the padded tensors (PyTorch applies it to the
    # zero-padded positions too, so no masking here).
    m1, m2 = _double_maxout(outputs_1, outputs_2,
                            params["maxout1"], params["maxout2"])

    contextual = jnp.concatenate([m1, m2], axis=-1)            # (L, B, 2H)
    contextual = jnp.transpose(contextual, (1, 0, 2))          # (B, L, 2H)

    # pad_packed_sequence pads only up to max(length) (length is concrete here).
    l_max = int(jnp.max(length))
    return contextual[:, :l_max, :], length


if __name__ == "__main__":
    # small shapes consistent with the module
    B, L = 2, 8       # batch, padded sequence length
    C = 64            # input feature size (fmap channels)
    H = 32            # LSTM hidden size -> gate width 4H = 128 (lane-dense)

    key = jax.random.PRNGKey(0)
    keys = iter(jax.random.split(key, 64))

    def bilstm_layer_params(in_size):
        # torch layouts: weight_ih (4H, in), weight_hh (4H, H), biases (4H,)
        # gate order [i, f, g, o]; kernel uses transposed (in,4H)/(H,4H) + fused bias.
        def one_direction():
            w_ih = 0.1 * jax.random.normal(next(keys), (4 * H, in_size), jnp.float32)
            w_hh = 0.1 * jax.random.normal(next(keys), (4 * H, H), jnp.float32)
            b_ih = 0.05 * jax.random.normal(next(keys), (4 * H,), jnp.float32)
            b_hh = 0.05 * jax.random.normal(next(keys), (4 * H,), jnp.float32)
            return (jnp.transpose(w_ih), jnp.transpose(w_hh),
                    (b_ih + b_hh).reshape(1, 4 * H))
        wi_f, wh_f, b_f = one_direction()
        wi_b, wh_b, b_b = one_direction()
        return dict(wi_f=wi_f, wh_f=wh_f, b_f=b_f,
                    wi_b=wi_b, wh_b=wh_b, b_b=b_b)

    def maxout_params():
        # torch nn.Linear(2H, H): weight (H, 2H), bias (H,) -> transposed (2H, H)
        def one_linear():
            w = 0.1 * jax.random.normal(next(keys), (H, 2 * H), jnp.float32)
            b = 0.05 * jax.random.normal(next(keys), (H,), jnp.float32)
            return jnp.transpose(w), b.reshape(1, H)
        wa, ba = one_linear()
        wb, bb = one_linear()
        return dict(wa=wa, ba=ba, wb=wb, bb=bb)

    params = dict(
        lstm1_l1=bilstm_layer_params(C),
        lstm1_l2=bilstm_layer_params(2 * H),
        lstm2_l1=bilstm_layer_params(2 * H),
        lstm2_l2=bilstm_layer_params(2 * H),
        maxout1=maxout_params(),
        maxout2=maxout_params(),
    )

    fmap = jax.random.normal(next(keys), (B, C, L), jnp.float32)
    length = jnp.array([L, 5], dtype=jnp.int32)   # variable lengths, max == L

    contextual_fmap, out_length = contextual_encoder_forward(fmap, length, params)
    jax.block_until_ready((contextual_fmap, out_length))

    assert contextual_fmap.shape == (B, L, 2 * H)
    assert contextual_fmap.dtype == jnp.float32
    assert out_length.shape == (B,)
    print("KERNEL_OK")
</pallas_src>

<mosaic_0001>
module attributes {stable_mosaic.version = 11 : i64} {
  func.func @_bilstm_layer_kernel(%arg0: memref<8x2x64xf32, #tpu.memory_space<vmem>>, %arg1: memref<8x2x1xf32, #tpu.memory_space<vmem>>, %arg2: memref<64x128xf32, #tpu.memory_space<vmem>>, %arg3: memref<32x128xf32, #tpu.memory_space<vmem>>, %arg4: memref<1x128xf32, #tpu.memory_space<vmem>>, %arg5: memref<64x128xf32, #tpu.memory_space<vmem>>, %arg6: memref<32x128xf32, #tpu.memory_space<vmem>>, %arg7: memref<1x128xf32, #tpu.memory_space<vmem>>, %arg8: memref<8x2x32xf32, #tpu.memory_space<vmem>>, %arg9: memref<8x2x32xf32, #tpu.memory_space<vmem>>, %arg10: memref<8x2x128xf32, #tpu.memory_space<vmem>>, %arg11: memref<8x2x128xf32, #tpu.memory_space<vmem>>, %arg12: memref<2x32xf32, #tpu.memory_space<vmem>>, %arg13: memref<2x32xf32, #tpu.memory_space<vmem>>, %arg14: memref<2x32xf32, #tpu.memory_space<vmem>>, %arg15: memref<2x32xf32, #tpu.memory_space<vmem>>) attributes {dimension_semantics = [], scalar_prefetch = 0 : i64, scratch_operands = 6 : i64, tpu.core_type = #tpu.core_type<tc>} {
    %c0 = arith.constant 0 : index
    %c0_0 = arith.constant 0 : index
    %c0_1 = arith.constant 0 : index
    %0 = vector.load %arg0[%c0, %c0_0, %c0_1] : memref<8x2x64xf32, #tpu.memory_space<vmem>>, vector<8x2x64xf32>
    %1 = vector.shape_cast %0 : vector<8x2x64xf32> to vector<16x64xf32>
    %c0_2 = arith.constant 0 : index
    %c0_3 = arith.constant 0 : index
    %2 = vector.load %arg2[%c0_2, %c0_3] : memref<64x128xf32, #tpu.memory_space<vmem>>, vector<64x128xf32>
    %cst = arith.constant dense<0.000000e+00> : vector<16x128xf32>
    %3 = tpu.matmul %1, %2, %cst {dimension_numbers = #tpu.dot_dimension_numbers<[1], [0], [0], [1], [0, 0, 1, 1], [], []>} : vector<16x64xf32>, vector<64x128xf32>, vector<16x128xf32> -> vector<16x128xf32>
    %c0_4 = arith.constant 0 : index
    %c0_5 = arith.constant 0 : index
    %4 = vector.load %arg4[%c0_4, %c0_5] : memref<1x128xf32, #tpu.memory_space<vmem>>, vector<1x128xf32>
    %5 = vector.broadcast %4 : vector<1x128xf32> to vector<16x128xf32>
    %6 = arith.addf %3, %5 : vector<16x128xf32>
    %7 = vector.shape_cast %6 : vector<16x128xf32> to vector<8x2x128xf32>
    %c0_6 = arith.constant 0 : index
    %c0_7 = arith.constant 0 : index
    %c0_8 = arith.constant 0 : index
    %8 = vector.load %arg10[%c0_6, %c0_7, %c0_8] : memref<8x2x128xf32, #tpu.memory_space<vmem>>, vector<8x2x128xf32>
    tpu.vector_store %arg10[%c0_6, %c0_7, %c0_8], %7 {strides = array<i32>} : memref<8x2x128xf32, #tpu.memory_space<vmem>>, vector<8x2x128xf32>,
    %c0_9 = arith.constant 0 : index
    %c0_10 = arith.constant 0 : index
    %9 = vector.load %arg5[%c0_9, %c0_10] : memref<64x128xf32, #tpu.memory_space<vmem>>, vector<64x128xf32>
    %cst_11 = arith.constant dense<0.000000e+00> : vector<16x128xf32>
    %10 = tpu.matmul %1, %9, %cst_11 {dimension_numbers = #tpu.dot_dimension_numbers<[1], [0], [0], [1], [0, 0, 1, 1], [], []>} : vector<16x64xf32>, vector<64x128xf32>, vector<16x128xf32> -> vector<16x128xf32>
    %c0_12 = arith.constant 0 : index
    %c0_13 = arith.constant 0 : index
    %11 = vector.load %arg7[%c0_12, %c0_13] : memref<1x128xf32, #tpu.memory_space<vmem>>, vector<1x128xf32>
    %12 = vector.broadcast %11 : vector<1x128xf32> to vector<16x128xf32>
    %13 = arith.addf %10, %12 : vector<16x128xf32>
    %14 = vector.shape_cast %13 : vector<16x128xf32> to vector<8x2x128xf32>
    %c0_14 = arith.constant 0 : index
    %c0_15 = arith.constant 0 : index
    %c0_16 = arith.constant 0 : index
    %15 = vector.load %arg11[%c0_14, %c0_15, %c0_16] : memref<8x2x128xf32, #tpu.memory_space<vmem>>, vector<8x2x128xf32>
    tpu.vector_store %arg11[%c0_14, %c0_15, %c0_16], %14 {strides = array<i32>} : memref<8x2x128xf32, #tpu.memory_space<vmem>>, vector<8x2x128xf32>,
    %c0_17 = arith.constant 0 : index
    %c0_18 = arith.constant 0 : index
    %16 = vector.load %arg3[%c0_17, %c0_18] : memref<32x128xf32, #tpu.memory_space<vmem>>, vector<32x128xf32>
    %c0_19 = arith.constant 0 : index
    %c0_20 = arith.constant 0 : index
    %17 = vector.load %arg6[%c0_19, %c0_20] : memref<32x128xf32, #tpu.memory_space<vmem>>, vector<32x128xf32>
    %cst_21 = arith.constant 0.000000e+00 : f32
    %18 = vector.broadcast %cst_21 : f32 to vector<2x32xf32>
    %c0_22 = arith.constant 0 : index
    %c0_23 = arith.constant 0 : index
    %19 = vector.load %arg12[%c0_22, %c0_23] : memref<2x32xf32, #tpu.memory_space<vmem>>, vector<2x32xf32>
    tpu.vector_store %arg12[%c0_22, %c0_23], %18 {strides = array<i32>} : memref<2x32xf32, #tpu.memory_space<vmem>>, vector<2x32xf32>,
    %cst_24 = arith.constant 0.000000e+00 : f32
    %20 = vector.broadcast %cst_24 : f32 to vector<2x32xf32>
    %c0_25 = arith.constant 0 : index
    %c0_26 = arith.constant 0 : index
    %21 = vector.load %arg13[%c0_25, %c0_26] : memref<2x32xf32, #tpu.memory_space<vmem>>, vector<2x32xf32>
    tpu.vector_store %arg13[%c0_25, %c0_26], %20 {strides = array<i32>} : memref<2x32xf32, #tpu.memory_space<vmem>>, vector<2x32xf32>,
    %c0_i32 = arith.constant 0 : i32
    %c8_i32 = arith.constant 8 : i32
    %22 = arith.addi %c0_i32, %c8_i32 : i32
    %c1_i32 = arith.constant 1 : i32
    scf.for %arg16 = %c0_i32 to %22 step %c1_i32  : i32 {
      %28 = arith.index_cast %arg16 : i32 to index
      %c0_38 = arith.constant 0 : index
      %c0_39 = arith.constant 0 : index
      %29 = vector.load %arg1[%28, %c0_38, %c0_39] : memref<8x2x1xf32, #tpu.memory_space<vmem>>, vector<1x2x1xf32>
      %30 = vector.shape_cast %29 : vector<1x2x1xf32> to vector<2x1xf32>
      %31 = arith.index_cast %arg16 : i32 to index
      %c0_40 = arith.constant 0 : index
      %c0_41 = arith.constant 0 : index
      %32 = vector.load %arg10[%31, %c0_40, %c0_41] : memref<8x2x128xf32, #tpu.memory_space<vmem>>, vector<1x2x128xf32>
      %33 = vector.shape_cast %32 : vector<1x2x128xf32> to vector<2x128xf32>
      %c0_42 = arith.constant 0 : index
      %c0_43 = arith.constant 0 : index
      %34 = vector.load %arg12[%c0_42, %c0_43] : memref<2x32xf32, #tpu.memory_space<vmem>>, vector<2x32xf32>
      %c0_44 = arith.constant 0 : index
      %c0_45 = arith.constant 0 : index
      %35 = vector.load %arg13[%c0_44, %c0_45] : memref<2x32xf32, #tpu.memory_space<vmem>>, vector<2x32xf32>
      %cst_46 = arith.constant dense<0.000000e+00> : vector<2x128xf32>
      %36 = tpu.matmul %34, %16, %cst_46 {dimension_numbers = #tpu.dot_dimension_numbers<[1], [0], [0], [1], [0, 0, 1, 1], [], []>} : vector<2x32xf32>, vector<32x128xf32>, vector<2x128xf32> -> vector<2x128xf32>
      %37 = arith.addf %33, %36 : vector<2x128xf32>
      %38 = vector.extract_strided_slice %37 {offsets = [0, 0], sizes = [2, 32], strides = [1, 1]} : vector<2x128xf32> to vector<2x32xf32>
      %cst_47 = arith.constant 0.000000e+00 : f32
      %39 = vector.broadcast %cst_47 : f32 to vector<2x32xf32>
      %40 = arith.subf %39, %38 : vector<2x32xf32>
      %41 = math.exp %40 : vector<2x32xf32>
      %cst_48 = arith.constant 1.000000e+00 : f32
      %42 = vector.broadcast %cst_48 : f32 to vector<2x32xf32>
      %43 = arith.addf %42, %41 : vector<2x32xf32>
      %cst_49 = arith.constant 1.000000e+00 : f32
      %44 = vector.broadcast %cst_49 : f32 to vector<2x32xf32>
      %45 = arith.divf %44, %43 : vector<2x32xf32>
      %46 = vector.extract_strided_slice %37 {offsets = [0, 32], sizes = [2, 32], strides = [1, 1]} : vector<2x128xf32> to vector<2x32xf32>
      %cst_50 = arith.constant 0.000000e+00 : f32
      %47 = vector.broadcast %cst_50 : f32 to vector<2x32xf32>
      %48 = arith.subf %47, %46 : vector<2x32xf32>
      %49 = math.exp %48 : vector<2x32xf32>
      %cst_51 = arith.constant 1.000000e+00 : f32
      %50 = vector.broadcast %cst_51 : f32 to vector<2x32xf32>
      %51 = arith.addf %50, %49 : vector<2x32xf32>
      %cst_52 = arith.constant 1.000000e+00 : f32
      %52 = vector.broadcast %cst_52 : f32 to vector<2x32xf32>
      %53 = arith.divf %52, %51 : vector<2x32xf32>
      %54 = vector.extract_strided_slice %37 {offsets = [0, 64], sizes = [2, 32], strides = [1, 1]} : vector<2x128xf32> to vector<2x32xf32>
      %55 = math.tanh %54 : vector<2x32xf32>
      %56 = vector.extract_strided_slice %37 {offsets = [0, 96], sizes = [2, 32], strides = [1, 1]} : vector<2x128xf32> to vector<2x32xf32>
      %cst_53 = arith.constant 0.000000e+00 : f32
      %57 = vector.broadcast %cst_53 : f32 to vector<2x32xf32>
      %58 = arith.subf %57, %56 : vector<2x32xf32>
      %59 = math.exp %58 : vector<2x32xf32>
      %cst_54 = arith.constant 1.000000e+00 : f32
      %60 = vector.broadcast %cst_54 : f32 to vector<2x32xf32>
      %61 = arith.addf %60, %59 : vector<2x32xf32>
      %cst_55 = arith.constant 1.000000e+00 : f32
      %62 = vector.broadcast %cst_55 : f32 to vector<2x32xf32>
      %63 = arith.divf %62, %61 : vector<2x32xf32>
      %64 = arith.mulf %53, %35 : vector<2x32xf32>
      %65 = arith.mulf %45, %55 : vector<2x32xf32>
      %66 = arith.addf %64, %65 : vector<2x32xf32>
      %67 = math.tanh %66 : vector<2x32xf32>
      %68 = arith.mulf %63, %67 : vector<2x32xf32>
      %69 = vector.broadcast %30 : vector<2x1xf32> to vector<2x32xf32>
      %70 = arith.mulf %69, %68 : vector<2x32xf32>
      %cst_56 = arith.constant 1.000000e+00 : f32
      %71 = vector.broadcast %cst_56 : f32 to vector<2x1xf32>
      %72 = arith.subf %71, %30 : vector<2x1xf32>
      %c0_57 = arith.constant 0 : index
      %c0_58 = arith.constant 0 : index
      %73 = vector.load %arg12[%c0_57, %c0_58] : memref<2x32xf32, #tpu.memory_space<vmem>>, vector<2x32xf32>
      %74 = vector.broadcast %72 : vector<2x1xf32> to vector<2x32xf32>
      %75 = arith.mulf %74, %73 : vector<2x32xf32>
      %76 = arith.addf %70, %75 : vector<2x32xf32>
      %c0_59 = arith.constant 0 : index
      %c0_60 = arith.constant 0 : index
      %77 = vector.load %arg12[%c0_59, %c0_60] : memref<2x32xf32, #tpu.memory_space<vmem>>, vector<2x32xf32>
      tpu.vector_store %arg12[%c0_59, %c0_60], %76 {strides = array<i32>} : memref<2x32xf32, #tpu.memory_space<vmem>>, vector<2x32xf32>,
      %78 = vector.broadcast %30 : vector<2x1xf32> to vector<2x32xf32>
      %79 = arith.mulf %78, %66 : vector<2x32xf32>
      %cst_61 = arith.constant 1.000000e+00 : f32
      %80 = vector.broadcast %cst_61 : f32 to vector<2x1xf32>
      %81 = arith.subf %80, %30 : vector<2x1xf32>
      %c0_62 = arith.constant 0 : index
      %c0_63 = arith.constant 0 : index
      %82 = vector.load %arg13[%c0_62, %c0_63] : memref<2x32xf32, #tpu.memory_space<vmem>>, vector<2x32xf32>
      %83 = vector.broadcast %81 : vector<2x1xf32> to vector<2x32xf32>
      %84 = arith.mulf %83, %82 : vector<2x32xf32>
      %85 = arith.addf %79, %84 : vector<2x32xf32>
      %c0_64 = arith.constant 0 : index
      %c0_65 = arith.constant 0 : index
      %86 = vector.load %arg13[%c0_64, %c0_65] : memref<2x32xf32, #tpu.memory_space<vmem>>, vector<2x32xf32>
      tpu.vector_store %arg13[%c0_64, %c0_65], %85 {strides = array<i32>} : memref<2x32xf32, #tpu.memory_space<vmem>>, vector<2x32xf32>,
      %87 = arith.index_cast %arg16 : i32 to index
      %c0_66 = arith.constant 0 : index
      %c0_67 = arith.constant 0 : index
      %88 = vector.load %arg8[%87, %c0_66, %c0_67] : memref<8x2x32xf32, #tpu.memory_space<vmem>>, vector<1x2x32xf32>
      %89 = vector.shape_cast %88 : vector<1x2x32xf32> to vector<2x32xf32>
      %90 = vector.shape_cast %70 : vector<2x32xf32> to vector<1x2x32xf32>
      tpu.vector_store %arg8[%87, %c0_66, %c0_67], %90 {strides = array<i32>} : memref<8x2x32xf32, #tpu.memory_space<vmem>>, vector<1x2x32xf32>,
    }
    %c8_i32_27 = arith.constant 8 : i32
    %cst_28 = arith.constant 0.000000e+00 : f32
    %23 = vector.broadcast %cst_28 : f32 to vector<2x32xf32>
    %c0_29 = arith.constant 0 : index
    %c0_30 = arith.constant 0 : index
    %24 = vector.load %arg14[%c0_29, %c0_30] : memref<2x32xf32, #tpu.memory_space<vmem>>, vector<2x32xf32>
    tpu.vector_store %arg14[%c0_29, %c0_30], %23 {strides = array<i32>} : memref<2x32xf32, #tpu.memory_space<vmem>>, vector<2x32xf32>,
    %cst_31 = arith.constant 0.000000e+00 : f32
    %25 = vector.broadcast %cst_31 : f32 to vector<2x32xf32>
    %c0_32 = arith.constant 0 : index
    %c0_33 = arith.constant 0 : index
    %26 = vector.load %arg15[%c0_32, %c0_33] : memref<2x32xf32, #tpu.memory_space<vmem>>, vector<2x32xf32>
    tpu.vector_store %arg15[%c0_32, %c0_33], %25 {strides = array<i32>} : memref<2x32xf32, #tpu.memory_space<vmem>>, vector<2x32xf32>,
    %c0_i32_34 = arith.constant 0 : i32
    %c8_i32_35 = arith.constant 8 : i32
    %27 = arith.addi %c0_i32_34, %c8_i32_35 : i32
    %c1_i32_36 = arith.constant 1 : i32
    scf.for %arg16 = %c0_i32_34 to %27 step %c1_i32_36  : i32 {
      %c7_i32 = arith.constant 7 : i32
      %28 = arith.subi %c7_i32, %arg16 : i32
      %29 = arith.index_cast %28 : i32 to index
      %c0_38 = arith.constant 0 : index
      %c0_39 = arith.constant 0 : index
      %30 = vector.load %arg1[%29, %c0_38, %c0_39] : memref<8x2x1xf32, #tpu.memory_space<vmem>>, vector<1x2x1xf32>
      %31 = vector.shape_cast %30 : vector<1x2x1xf32> to vector<2x1xf32>
      %32 = arith.index_cast %28 : i32 to index
      %c0_40 = arith.constant 0 : index
      %c0_41 = arith.constant 0 : index
      %33 = vector.load %arg11[%32, %c0_40, %c0_41] : memref<8x2x128xf32, #tpu.memory_space<vmem>>, vector<1x2x128xf32>
      %34 = vector.shape_cast %33 : vector<1x2x128xf32> to vector<2x128xf32>
      %c0_42 = arith.constant 0 : index
      %c0_43 = arith.constant 0 : index
      %35 = vector.load %arg14[%c0_42, %c0_43] : memref<2x32xf32, #tpu.memory_space<vmem>>, vector<2x32xf32>
      %c0_44 = arith.constant 0 : index
      %c0_45 = arith.constant 0 : index
      %36 = vector.load %arg15[%c0_44, %c0_45] : memref<2x32xf32, #tpu.memory_space<vmem>>, vector<2x32xf32>
      %cst_46 = arith.constant dense<0.000000e+00> : vector<2x128xf32>
      %37 = tpu.matmul %35, %17, %cst_46 {dimension_numbers = #tpu.dot_dimension_numbers<[1], [0], [0], [1], [0, 0, 1, 1], [], []>} : vector<2x32xf32>, vector<32x128xf32>, vector<2x128xf32> -> vector<2x128xf32>
      %38 = arith.addf %34, %37 : vector<2x128xf32>
      %39 = vector.extract_strided_slice %38 {offsets = [0, 0], sizes = [2, 32], strides = [1, 1]} : vector<2x128xf32> to vector<2x32xf32>
      %cst_47 = arith.constant 0.000000e+00 : f32
      %40 = vector.broadcast %cst_47 : f32 to vector<2x32xf32>
      %41 = arith.subf %40, %39 : vector<2x32xf32>
      %42 = math.exp %41 : vector<2x32xf32>
      %cst_48 = arith.constant 1.000000e+00 : f32
      %43 = vector.broadcast %cst_48 : f32 to vector<2x32xf32>
      %44 = arith.addf %43, %42 : vector<2x32xf32>
      %cst_49 = arith.constant 1.000000e+00 : f32
      %45 = vector.broadcast %cst_49 : f32 to vector<2x32xf32>
      %46 = arith.divf %45, %44 : vector<2x32xf32>
      %47 = vector.extract_strided_slice %38 {offsets = [0, 32], sizes = [2, 32], strides = [1, 1]} : vector<2x128xf32> to vector<2x32xf32>
      %cst_50 = arith.constant 0.000000e+00 : f32
      %48 = vector.broadcast %cst_50 : f32 to vector<2x32xf32>
      %49 = arith.subf %48, %47 : vector<2x32xf32>
      %50 = math.exp %49 : vector<2x32xf32>
      %cst_51 = arith.constant 1.000000e+00 : f32
      %51 = vector.broadcast %cst_51 : f32 to vector<2x32xf32>
      %52 = arith.addf %51, %50 : vector<2x32xf32>
      %cst_52 = arith.constant 1.000000e+00 : f32
      %53 = vector.broadcast %cst_52 : f32 to vector<2x32xf32>
      %54 = arith.divf %53, %52 : vector<2x32xf32>
      %55 = vector.extract_strided_slice %38 {offsets = [0, 64], sizes = [2, 32], strides = [1, 1]} : vector<2x128xf32> to vector<2x32xf32>
      %56 = math.tanh %55 : vector<2x32xf32>
      %57 = vector.extract_strided_slice %38 {offsets = [0, 96], sizes = [2, 32], strides = [1, 1]} : vector<2x128xf32> to vector<2x32xf32>
      %cst_53 = arith.constant 0.000000e+00 : f32
      %58 = vector.broadcast %cst_53 : f32 to vector<2x32xf32>
      %59 = arith.subf %58, %57 : vector<2x32xf32>
      %60 = math.exp %59 : vector<2x32xf32>
      %cst_54 = arith.constant 1.000000e+00 : f32
      %61 = vector.broadcast %cst_54 : f32 to vector<2x32xf32>
      %62 = arith.addf %61, %60 : vector<2x32xf32>
      %cst_55 = arith.constant 1.000000e+00 : f32
      %63 = vector.broadcast %cst_55 : f32 to vector<2x32xf32>
      %64 = arith.divf %63, %62 : vector<2x32xf32>
      %65 = arith.mulf %54, %36 : vector<2x32xf32>
      %66 = arith.mulf %46, %56 : vector<2x32xf32>
      %67 = arith.addf %65, %66 : vector<2x32xf32>
      %68 = math.tanh %67 : vector<2x32xf32>
      %69 = arith.mulf %64, %68 : vector<2x32xf32>
      %70 = vector.broadcast %31 : vector<2x1xf32> to vector<2x32xf32>
      %71 = arith.mulf %70, %69 : vector<2x32xf32>
      %cst_56 = arith.constant 1.000000e+00 : f32
      %72 = vector.broadcast %cst_56 : f32 to vector<2x1xf32>
      %73 = arith.subf %72, %31 : vector<2x1xf32>
      %c0_57 = arith.constant 0 : index
      %c0_58 = arith.constant 0 : index
      %74 = vector.load %arg14[%c0_57, %c0_58] : memref<2x32xf32, #tpu.memory_space<vmem>>, vector<2x32xf32>
      %75 = vector.broadcast %73 : vector<2x1xf32> to vector<2x32xf32>
      %76 = arith.mulf %75, %74 : vector<2x32xf32>
      %77 = arith.addf %71, %76 : vector<2x32xf32>
      %c0_59 = arith.constant 0 : index
      %c0_60 = arith.constant 0 : index
      %78 = vector.load %arg14[%c0_59, %c0_60] : memref<2x32xf32, #tpu.memory_space<vmem>>, vector<2x32xf32>
      tpu.vector_store %arg14[%c0_59, %c0_60], %77 {strides = array<i32>} : memref<2x32xf32, #tpu.memory_space<vmem>>, vector<2x32xf32>,
      %79 = vector.broadcast %31 : vector<2x1xf32> to vector<2x32xf32>
      %80 = arith.mulf %79, %67 : vector<2x32xf32>
      %cst_61 = arith.constant 1.000000e+00 : f32
      %81 = vector.broadcast %cst_61 : f32 to vector<2x1xf32>
      %82 = arith.subf %81, %31 : vector<2x1xf32>
      %c0_62 = arith.constant 0 : index
      %c0_63 = arith.constant 0 : index
      %83 = vector.load %arg15[%c0_62, %c0_63] : memref<2x32xf32, #tpu.memory_space<vmem>>, vector<2x32xf32>
      %84 = vector.broadcast %82 : vector<2x1xf32> to vector<2x32xf32>
      %85 = arith.mulf %84, %83 : vector<2x32xf32>
      %86 = arith.addf %80, %85 : vector<2x32xf32>
      %c0_64 = arith.constant 0 : index
      %c0_65 = arith.constant 0 : index
      %87 = vector.load %arg15[%c0_64, %c0_65] : memref<2x32xf32, #tpu.memory_space<vmem>>, vector<2x32xf32>
      tpu.vector_store %arg15[%c0_64, %c0_65], %86 {strides = array<i32>} : memref<2x32xf32, #tpu.memory_space<vmem>>, vector<2x32xf32>,
      %88 = arith.index_cast %28 : i32 to index
      %c0_66 = arith.constant 0 : index
      %c0_67 = arith.constant 0 : index
      %89 = vector.load %arg9[%88, %c0_66, %c0_67] : memref<8x2x32xf32, #tpu.memory_space<vmem>>, vector<1x2x32xf32>
      %90 = vector.shape_cast %89 : vector<1x2x32xf32> to vector<2x32xf32>
      %91 = vector.shape_cast %71 : vector<2x32xf32> to vector<1x2x32xf32>
      tpu.vector_store %arg9[%88, %c0_66, %c0_67], %91 {strides = array<i32>} : memref<8x2x32xf32, #tpu.memory_space<vmem>>, vector<1x2x32xf32>,
    }
    %c8_i32_37 = arith.constant 8 : i32
    return
  }
}

</mosaic_0001>

<bundles_post_ra>
// kernel: tpu_custom_call.1
= control target key start
LH: loop header
LB: loop body
LE: loop exit
PB: predicated region body
PF: predicated region fallthrough
CT: control target
= control target key end

     0   :  { %15 = vsyncpa [#allocation9], 0  ;;  %s1482_s0 = inlined_call_operand.hbm [shape: f32[8,2,64], index: 0, kind: input, shape index: {}]   ;;  %s1483_s1 = inlined_call_operand.vmem [shape: f32[8,2,1], index: 1, kind: input, shape index: {}]   ;;  %s1484_s2 = inlined_call_operand.hbm [shape: f32[64,128], index: 2, kind: input, shape index: {}]   ;;  %s1485_s3 = inlined_call_operand.hbm [shape: f32[32,128], index: 3, kind: input, shape index: {}]   ;;  %s1486_s4 = inlined_call_operand.vmem [shape: f32[1,128], index: 4, kind: input, shape index: {}]   ;;  %s1487_s5 = inlined_call_operand.hbm [shape: f32[64,128], index: 5, kind: input, shape index: {}]   ;;  %s1488_s6 = inlined_call_operand.vmem [shape: f32[32,128], index: 6, kind: input, shape index: {}]   ;;  %s1489_s7 = inlined_call_operand.vmem [shape: f32[1,128], index: 7, kind: input, shape index: {}]   ;;  %s1490_s8 = inlined_call_operand.hbm [shape: f32[8,2,32], index: 8, kind: output, shape index: {0}]   ;;  %s1491_s9 = inlined_call_operand.hbm [shape: f32[8,2,32], index: 9, kind: output, shape index: {1}]  }
   0x1   :  { %16 = vsyncpa [#allocation12], 0 }
   0x2   :  { %17 = vsyncpa [#allocation15], 0 }
   0x3   :  { %18 = vsyncpa [#allocation10], 0 }
   0x4   :  { %19 = vsyncpa [#allocation18], 0  ;;  %s1186_s30 = smov [#allocation11]   ;;  %s1028_s13 = scalar_lea.hbm %s1484_s2, 1024 }
   0x5   :  { %s39_s10 = sshll.u32 %s1186_s30, 4  ;;  %p1029_p0 = scmp.ne.s32.totalorder %s1484_s2, %s1028_s13  ;;  %s40_s10 = int_to_ptr.vmem [resolvable:$true] %s39_s10 }
   0x6   :  { %p1032_p1 = scmp.lt.u32.totalorder %s1028_s13, %s1484_s2 }
   0x8   :  { %p1034_p2 = pnand %p1032_p1, %p1029_p0 }
   0xa   :  { %1037 = shalt.err (!%p1034_p2)
}
   0xb   :  { %s1038_s18 = scalar_lea.vmem %s40_s10, 1024  ;;  %p1043_p4 = scmp.lt.s32.totalorder %s40_s10, %s40_s10 }
   0xc   :  { %p1039_p3 = scmp.ne.s32.totalorder %s40_s10, %s1038_s18  ;;  %p1044_p5 = scmp.lt.s32.totalorder %s1038_s18, %s1038_s18 }
   0xe   :  { %p1045_p6 = por %p1044_p5, %p1043_p4 }
  0x10   :  { %p1046_p7 = pnand %p1045_p6, %p1039_p3 }
  0x12   :  { %1049 = shalt.err (!%p1046_p7)
}
  0x13   :  { %s1187_s19 = smov 128   ;;  %s1188_s20 = smov 8  }
  0x14   :  { %45 = dma.hbm_to_vmem [thread:$0]  %s1484_s2, 1024, %s40_s10, [#allocation12], %s1187_s19, %s1187_s19, %s1188_s20  }
  0x15   :  { %s1189_s23 = smov [#allocation8]   ;;  %s1050_s27 = scalar_lea.hbm %s1482_s0, 256 }
  0x16   :  { %s25_s24 = sshll.u32 %s1189_s23, 4  ;;  %p1051_p8 = scmp.ne.s32.totalorder %s1482_s0, %s1050_s27  ;;  %s26_s24 = int_to_ptr.vmem [resolvable:$true] %s25_s24 }
  0x17   :  { %p1054_p9 = scmp.lt.u32.totalorder %s1050_s27, %s1482_s0 }
  0x19   :  { %p1056_p10 = pnand %p1054_p9, %p1051_p8 }
  0x1b   :  { %1059 = shalt.err (!%p1056_p10)
}
  0x1c   :  { %s1060_s12 = scalar_lea.vmem %s26_s24, 256  ;;  %p1065_p12 = scmp.lt.s32.totalorder %s26_s24, %s26_s24 }
  0x1d   :  { %p1061_p11 = scmp.ne.s32.totalorder %s26_s24, %s1060_s12  ;;  %p1066_p13 = scmp.lt.s32.totalorder %s1060_s12, %s1060_s12 }
  0x1f   :  { %p1067_p0 = por %p1066_p13, %p1065_p12 }
  0x21   :  { %p1068_p1 = pnand %p1067_p0, %p1061_p11 }
  0x23   :  { %1071 = shalt.err (!%p1068_p1)
}
  0x24   :  { %s1190_s2 = smov 32   ;;  %s1191_s10 = smov 2  }
  0x25   :  { %31 = dma.hbm_to_vmem [thread:$0]  %s1482_s0, 256, %s26_s24, [#allocation9], %s1190_s2, %s1190_s2, %s1191_s10  }
  0x26   :  { %s1192_s15 = smov [#allocation13]   ;;  %s1193_s17 = smov [#allocation14]  }
  0x27   :  { %s51_s16 = sshll.u32 %s1192_s15, 4  ;;  %s65_s18 = sshll.u32 %s1193_s17, 4  ;;  %s52_s16 = int_to_ptr.vmem [resolvable:$true] %s51_s16  ;;  %s1292_s18 = int_to_ptr.vmem [resolvable:$true] %s65_s18 }
  0x28   :  { %s1072_s23 = scalar_lea.hbm %s1485_s3, 512 }
  0x29   :  { %p1073_p2 = scmp.ne.s32.totalorder %s1485_s3, %s1072_s23  ;;  %p1076_p3 = scmp.lt.u32.totalorder %s1072_s23, %s1485_s3 }
  0x2b   :  { %p1078_p4 = pnand %p1076_p3, %p1073_p2 }
  0x2d   :  { %1081 = shalt.err (!%p1078_p4)
}
  0x2e   :  { %s1082_s0 = scalar_lea.vmem %s52_s16, 512  ;;  %p1087_p6 = scmp.lt.s32.totalorder %s52_s16, %s52_s16 }
  0x2f   :  { %p1083_p5 = scmp.ne.s32.totalorder %s52_s16, %s1082_s0  ;;  %p1088_p7 = scmp.lt.s32.totalorder %s1082_s0, %s1082_s0 }
  0x31   :  { %p1089_p8 = por %p1088_p7, %p1087_p6 }
  0x33   :  { %p1090_p9 = pnand %p1089_p8, %p1083_p5 }
  0x35   :  { %1093 = shalt.err (!%p1090_p9)
}
  0x36   :  { %57 = dma.hbm_to_vmem [thread:$0]  %s1485_s3, 512, %s52_s16, [#allocation12], %s1187_s19, %s1187_s19, %s1188_s20  }
  0x37   :  { %s1094_s12 = scalar_lea.hbm %s1487_s5, 1024 }
  0x38   :  { %p1095_p10 = scmp.ne.s32.totalorder %s1487_s5, %s1094_s12  ;;  %p1098_p11 = scmp.lt.u32.totalorder %s1094_s12, %s1487_s5 }
  0x3a   :  { %p1100_p12 = pnand %p1098_p11, %p1095_p10 }
  0x3c   :  { %1103 = shalt.err (!%p1100_p12)
}
  0x3d   :  { %s1104_s21 = scalar_lea.vmem %s1292_s18, 1024  ;;  %p1109_p0 = scmp.lt.s32.totalorder %s1292_s18, %s1292_s18 }
  0x3e   :  { %p1105_p13 = scmp.ne.s32.totalorder %s1292_s18, %s1104_s21  ;;  %p1110_p1 = scmp.lt.s32.totalorder %s1104_s21, %s1104_s21 }
  0x40   :  { %p1111_p2 = por %p1110_p1, %p1109_p0 }
  0x42   :  { %p1112_p3 = pnand %p1111_p2, %p1105_p13 }
  0x44   :  { %1115 = shalt.err (!%p1112_p3)
}
  0x45   :  { %71 = dma.hbm_to_vmem [thread:$0]  %s1487_s5, 1024, %s1292_s18, [#allocation15], %s1187_s19, %s1187_s19, %s1188_s20  }
  0x46   :  { %1168 = dma.done.wait [#allocation9], 256  }
  0x47   :  { %1169 = vsyncadd [#allocation9], 4294967040 }
  0x48   :  { %1170 = dma.done.wait [#allocation12], 1536  }
  0x49   :  { %1171 = vsyncadd [#allocation12], 4294965760 }
  0x4a   :  { %1172 = dma.done.wait [#allocation15], 1024  }
  0x4b   :  { %1173 = vsyncadd [#allocation15], 4294966272  ;;  %vm435_vm0 = vcmask 254976   ;;  %v1194_v0 = vmov 0.0   ;;  %v1195_v1 = vmov 1983009808   ;;  %v124_v3 = vlaneseq }
  0x4c   :  { %436 = vst.msk [vmem:[#allocation4] sm:$0x3] %vm435_vm0, %v1194_v0  ;;  %437 = vst.msk [vmem:[#allocation5] sm:$0x3] %vm435_vm0, %v1194_v0  ;;  %v122_v2 = vunpack.c.l.s4 %v1195_v1  ;;  %v1333_v4 = vld [vmem:[#allocation13] sm:$0xff]  ;;  %v1335_v5 = vld [vmem:[#allocation13 + $0x8] sm:$0xff] }
  0x4d   :  { %v1337_v6 = vld [vmem:[#allocation13 + $0x10] sm:$0xff]  ;;  %v1339_v7 = vld [vmem:[#allocation13 + $0x18] sm:$0xff]  ;;  %v1344_v8 = vld [vmem:[%s1488_s6] sm:$0xff]  ;;  %v125_v17 = vshrl.u32 %v124_v3, 7  ;;  %vm153_vm1 = vcmask 523264  }
  0x4e   :  { %v1349_v9 = vld [vmem:[%s1488_s6 + $0x8] sm:$0xff]  ;;  %v1354_v10 = vld [vmem:[%s1488_s6 + $0x10] sm:$0xff]  ;;  %v1359_v11 = vld [vmem:[%s1488_s6 + $0x18] sm:$0xff]  ;;  %v123_v16 = vunpack.c.0.s8 %v122_v2 }
  0x4f   :  { %v96_v12 = vld [vmem:[#allocation11] sm:$0xff]  ;;  %v97_v13 = vld [vmem:[#allocation11 + $0x8] sm:$0xff]  ;;  %v98_v20 = vld [vmem:[#allocation11 + $0x10] sm:$0xff] }
  0x50   :  { %v285_v14 = vld [vmem:[#allocation14] sm:$0xff]  ;;  %v286_v15 = vld [vmem:[#allocation14 + $0x8] sm:$0xff]  ;;  %v922_v18 = vpack.c.bf16 %v97_v13, %v96_v12  ;;  %v99_v21 = vld [vmem:[#allocation11 + $0x18] sm:$0xff]  ;;  %v1361_v34 = vsub.s32 %v123_v16, %v125_v17 }
  0x51   :  { %v938_v19 = vpack.c.bf16 %v286_v15, %v285_v14  ;;  %v287_v22 = vld [vmem:[#allocation14 + $0x10] sm:$0xff]  ;;  %v926_v23 = vpack.c.bf16 %v99_v21, %v98_v20  ;;  %v288_v24 = vld [vmem:[#allocation14 + $0x18] sm:$0xff]  ;;  %v100_v25 = vld [vmem:[#allocation11 + $0x20] sm:$0xff] }
  0x52   :  { %v101_v26 = vld [vmem:[#allocation11 + $0x28] sm:$0xff]  ;;  %923 = vmatprep.subr.bf16.mxu0 %v922_v18  ;;  %v942_v27 = vpack.c.bf16 %v288_v24, %v287_v22  ;;  %v289_v28 = vld [vmem:[#allocation14 + $0x20] sm:$0xff]  ;;  %v102_v30 = vld [vmem:[#allocation11 + $0x30] sm:$0xff] }
  0x53   :  { %939 = vmatprep.subr.bf16.mxu1 %v938_v19  ;;  %v290_v29 = vld [vmem:[#allocation14 + $0x28] sm:$0xff]  ;;  %925 = vmatpush3.bf16.msra.mxu0 %v922_v18  ;;  %v103_v31 = vld [vmem:[#allocation11 + $0x38] sm:$0xff]  ;;  %v291_v32 = vld [vmem:[#allocation14 + $0x30] sm:$0xff]  ;;  %v930_v35 = vpack.c.bf16 %v101_v26, %v100_v25 }
  0x54   :  { %941 = vmatpush3.bf16.msra.mxu1 %v938_v19  ;;  %v292_v33 = vld [vmem:[#allocation14 + $0x38] sm:$0xff]  ;;  %927 = vmatprep.subr.bf16.mxu0 %v926_v23  ;;  %v946_v36 = vpack.c.bf16 %v290_v29, %v289_v28  ;;  %v88_v37 = vld [vmem:[#allocation8] sm:$0x3]  ;;  %v89_v38 = vld [vmem:[#allocation8 + $0x2] sm:$0x3]  ;;  %v934_v50 = vpack.c.bf16 %v103_v31, %v102_v30 }
  0x55   :  { %943 = vmatprep.subr.bf16.mxu1 %v942_v27  ;;  %v90_v39 = vld [vmem:[#allocation8 + $0x4] sm:$0x3]  ;;  %v91_v40 = vld [vmem:[#allocation8 + $0x6] sm:$0x3]  ;;  %v119_v41 = vcombine.low %v88_v37, %v89_v38  ;;  %v92_v42 = vld [vmem:[#allocation8 + $0x8] sm:$0x3]  ;;  %v950_v51 = vpack.c.bf16 %v292_v33, %v291_v32 }
  0x56   :  { %v93_v43 = vld [vmem:[#allocation8 + $0xa] sm:$0x3]  ;;  %v120_v44 = vcombine.low %v90_v39, %v91_v40  ;;  %v94_v45 = vld [vmem:[#allocation8 + $0xc] sm:$0x3]  ;;  %v95_v46 = vld [vmem:[#allocation8 + $0xe] sm:$0x3] }
  0x57   :  { %v136_v47 = vcombine.low %v92_v42, %v93_v43  ;;  %929 = vmatpush3.bf16.msra.mxu0 %v926_v23  ;;  %v127_v48 = vrot.slane %v119_v41, %v1361_v34  ;;  %v137_v49 = vcombine.low %v94_v45, %v95_v46  ;;  %v814_v57 = vld [vmem:[%s1486_s4] ss:$0 sm:$0xff]  ;;  %s1381_s4 = smov 0  }
  0x58   :  { %945 = vmatpush3.bf16.msra.mxu1 %v942_v27  ;;  %931 = vmatprep.subr.bf16.mxu0 %v930_v35  ;;  %v134_v52 = vrot.slane %v120_v44, %v1361_v34  ;;  %v821_v58 = vld [vmem:[%s1489_s7] ss:$0 sm:$0xff] }
  0x59   :  { %947 = vmatprep.subr.bf16.mxu1 %v946_v36  ;;  %v144_v54 = vrot.slane %v136_v47, %v1361_v34  ;;  %v151_v55 = vrot.slane %v137_v49, %v1361_v34 }
  0x5a   :  { %v135_v53 = vcombine.low %v127_v48, %v134_v52 }
  0x5b   :  { %933 = vmatpush3.bf16.msra.mxu0 %v930_v35  ;;  %v152_v56 = vcombine.low %v144_v54, %v151_v55 }
  0x5c   :  { %949 = vmatpush3.bf16.msra.mxu1 %v946_v36  ;;  %935 = vmatprep.subr.bf16.mxu0 %v934_v50 }
  0x5d   :  { %951 = vmatprep.subr.bf16.mxu1 %v950_v51  ;;  %878 = vmatprep.mubr.msk.f32.mxu0 %vm153_vm1, %v135_v53 }
  0x5e   :  { %897 = vmatprep.mubr.msk.f32.mxu1 %vm153_vm1, %v135_v53 }
  0x5f   :  { %937 = vmatpush3.bf16.msra.mxu0 %v934_v50 }
  0x60   :  { %953 = vmatpush3.bf16.msra.mxu1 %v950_v51 }
  0x62   :  { %879 = vmatmul.mubr.msk.f32.vlgmr.msra.gmra.mrb[0].mxu0 %vm153_vm1, %v152_v56 }
  0x63   :  { %898 = vmatmul.mubr.msk.f32.vlgmr.msra.gmra.mrb[0].mxu1 %vm153_vm1, %v152_v56 }
 0x135   :  { %v880_v59 = vpop.f32.mrb[0].mxu0 }
 0x136   :  { %v899_v60 = vpop.f32.mrb[0].mxu1  ;;  %v230_v61 = vadd.f32 %v880_v59, %v814_v57  ;;  %v224_v63 = vpop.f32.mrb[1].mxu0 }
 0x137   :  { %v372_v62 = vadd.f32 %v899_v60, %v821_v58  ;;  %v366_v1 = vpop.f32.mrb[1].mxu1  ;;  %v225_v2 = vadd.f32 %v814_v57, %v224_v63 }
 0x138   :  { %v367_v3 = vadd.f32 %v821_v58, %v366_v1  ;;  %v252_v12 = vcombine.high %v230_v61, %v230_v61  ;;  %v259_v13 = vrot.slane %v230_v61, %v1361_v34  ;;  %819 = vst.sshfl [vmem:[#allocation2 + $0x8] sm:$0x3 pattern:$0x76325410] %v230_v61 }
 0x139   :  { %v394_v14 = vcombine.high %v372_v62, %v372_v62  ;;  %v401_v15 = vrot.slane %v372_v62, %v1361_v34  ;;  %826 = vst.sshfl [vmem:[#allocation3 + $0x8] sm:$0x3 pattern:$0x76325410] %v372_v62  ;;  %v235_v16 = vcombine.high %v225_v2, %v225_v2  ;;  %v242_v17 = vrot.slane %v225_v2, %v1361_v34 }
 0x13a   :  { %817 = vst.sshfl [vmem:[#allocation2] sm:$0x3 pattern:$0x76325410] %v225_v2  ;;  %v377_v18 = vcombine.high %v367_v3, %v367_v3  ;;  %v384_v19 = vrot.slane %v367_v3, %v1361_v34  ;;  %v266_v20 = vrot.slane %v252_v12, %v1361_v34  ;;  %v267_v21 = vcombine.high %v259_v13, %v259_v13 }
 0x13b   :  { %824 = vst.sshfl [vmem:[#allocation3] sm:$0x3 pattern:$0x76325410] %v367_v3  ;;  %v408_v22 = vrot.slane %v394_v14, %v1361_v34  ;;  %v409_v23 = vcombine.high %v401_v15, %v401_v15  ;;  %v249_v24 = vrot.slane %v235_v16, %v1361_v34  ;;  %v250_v25 = vcombine.high %v242_v17, %v242_v17 }
 0x13c   :  { %820 = vst.sshfl [vmem:[#allocation2 + $0xc] sm:$0x3 pattern:$0x76325410] %v252_v12  ;;  %v391_v26 = vrot.slane %v377_v18, %v1361_v34  ;;  %v392_v27 = vcombine.high %v384_v19, %v384_v19  ;;  %v268_v28 = vcombine.high %v266_v20, %v266_v20  ;;  %282 = vst [vmem:[#allocation2 + $0xa] sm:$0x3] %v267_v21 }
 0x13d   :  { %827 = vst.sshfl [vmem:[#allocation3 + $0xc] sm:$0x3 pattern:$0x76325410] %v394_v14  ;;  %v410_v29 = vcombine.high %v408_v22, %v408_v22  ;;  %424 = vst [vmem:[#allocation3 + $0xa] sm:$0x3] %v409_v23  ;;  %v251_v30 = vcombine.high %v249_v24, %v249_v24 }
 0x13e   :  { %818 = vst.sshfl [vmem:[#allocation2 + $0x4] sm:$0x3 pattern:$0x76325410] %v235_v16  ;;  %278 = vst [vmem:[#allocation2 + $0x2] sm:$0x3] %v250_v25  ;;  %v393_v31 = vcombine.high %v391_v26, %v391_v26 }
 0x13f   :  { %825 = vst.sshfl [vmem:[#allocation3 + $0x4] sm:$0x3 pattern:$0x76325410] %v377_v18  ;;  %420 = vst [vmem:[#allocation3 + $0x2] sm:$0x3] %v392_v27 }
 0x140   :  { %284 = vst [vmem:[#allocation2 + $0xe] sm:$0x3] %v268_v28  ;;  %426 = vst [vmem:[#allocation3 + $0xe] sm:$0x3] %v410_v29 }
 0x141   :  { %280 = vst [vmem:[#allocation2 + $0x6] sm:$0x3] %v251_v30  ;;  %422 = vst [vmem:[#allocation3 + $0x6] sm:$0x3] %v393_v31 }
 0x142 LB: > { %v955_v32 = vpack.c.bf16 %v1335_v5, %v1333_v4  ;;  %v1196_v33 = vmov 0.0|0.0   ;;  %v958_v34 = vpack.c.bf16 %v1339_v7, %v1337_v6  ;;  %vm1197_vm2 = vmmov 0   ;;  %v449_v36 = vld [vmem:[#allocation4] sm:$0x3]  ;;  %s1392_s7 = sshll.u32 %s1180_s4, 1  ;;  %s1200_s29 = smov 64   ;;  %s1180_s4 = sphi %s1381_s4, %s443_s4  }
 0x143   : > { %954 = vmatprep.subr.bf16.mxu0 %v1196_v33  ;;  %v1198_v35 = vmov 0.0   ;;  %vm451_vm3 = vcmask 261120   ;;  %v1199_v37 = vmov 0   ;;  %s447_s24 = scalar_lea.vmem [#allocation2], %s1392_s7  ;;  %v450_v43 = vld [vmem:[#allocation5] sm:$0x3]  ;;  %s445_s12 = scalar_lea.vmem %s1483_s1, %s1392_s7 }
 0x144   : > { %956 = vmatpush3.bf16.msra.mxu0 %v955_v32  ;;  %908 = vmatprep.mubr.msk.f32.mxu0 %vm1197_vm2, %v1198_v35  ;;  %s1201_s13 = smov 32   ;;  %v446_v44 = vld [vmem:[%s445_s12] sm:$0x3]  ;;  %v578_v58 = vld [vmem:[#allocation5] sm:$0x3]  ;;  %s1202_s14 = smov 96  }
 0x145   : > { %957 = vmatprep.subr.bf16.mxu0 %v1196_v33  ;;  %1009 = vset.pattern.permute.xlu0 %v1199_v37  ;;  %v560_v52 = vsub.f32 1.0, %v446_v44  ;;  %s594_s15 = scalar_lea.vmem [#allocation16], %s1392_s7  ;;  %s443_s4 = sadd.s32 1, %s1180_s4  }
 0x146   : > { %1008 = vset.pattern.permute.xlu1 %v1199_v37  ;;  %p440_p4 = scmp.ge.s32.totalorder %s443_s4, 8  }
 0x147   :  { %596 = vst.msk [vmem:[#allocation6] sm:$0x3] (%p440_p4), %vm435_vm0, %v1194_v0  ;;  %597 = vst.msk [vmem:[#allocation7] sm:$0x3] (%p440_p4), %vm435_vm0, %v1194_v0  ;;  %s1415_s17 = smov (%p440_p4), 0  }
 0x148   : > { %959 = vmatpush3.bf16.msra.mxu0 %v958_v34  ;;  %v448_v38 = vld [vmem:[%s447_s24] sm:$0x3] }
 0x14b   : > { %909 = vmatmul.mubr.msk.f32.vlgmr.msra.gmra.mrb[0].mxu0 %vm451_vm3, %v449_v36 }
 0x21e   : > { %v521_v39 = vpop.f32.mrb[0].mxu0 }
 0x21f   : > { %v525_v40 = vadd.f32 %v521_v39, %v448_v38  ;;  %v910_v41 = vpop.f32.mrb[1].mxu0 }
 0x221   : > { %1010 = vtanh.f32 %v525_v40  ;;  %v526_v45 = vsub.f32 0.0, %v525_v40 }
 0x223   : > { %v527_v46 = vmul.f32 1.442695, %v526_v45 }
 0x225   : > { %1012 = vpow2.f32 %v527_v46 }
 0x22b   : > { %v1011_v42 = vpop.eup %1010 }
 0x22c   : > { %539 = vrot.lane.b32.xlu0 %v1011_v42, %s1200_s29 }
 0x22f   : > { %v1013_v47 = vpop.eup %1012 }
 0x230   : > { %534 = vrot.lane.b32.xlu0 %v450_v43, %s1201_s13  ;;  %v529_v48 = vadd.f32 1.0, %v1013_v47 }
 0x232   : > { %1014 = vrcp.f32 %v529_v48 }
 0x234   : > { %556 = vperm.xlu0 %1009, %v446_v44  }
 0x23c   : > { %v1015_v49 = vpop.eup %1014 }
 0x29e   : > { %v540_v50 = vpop.permute.xlu0 %539 }
 0x29f   : > { %v542_v51 = vmul.f32 %v1015_v49, %v540_v50 }
 0x2a1   : > { %544 = vrot.lane.b32.xlu1 %v542_v51, %s1201_s13 }
 0x2a2   : > { %v535_v53 = vpop.permute.xlu0 %534 }
 0x2a3   : > { %v537_v54 = vmul.f32 %v1015_v49, %v535_v53 }
 0x2a5   : > { %563 = vperm.xlu1 %1008, %v560_v52  }
 0x2b3   : > { %v557_v1 = vpop.permute.xlu0 %556 }
 0x313   : > { %v545_v55 = vpop.permute.xlu1 %544 }
 0x314   : > { %v547_v56 = vadd.f32 %v545_v55, %v537_v54 }
 0x316   : > { %1016 = vtanh.f32 %v547_v56  ;;  %v577_v2 = vmul.f32 %v557_v1, %v547_v56 }
 0x320   : > { %v1017_v57 = vpop.eup %1016 }
 0x321   : > { %550 = vrot.lane.b32.xlu1 %v1017_v57, %s1200_s29 }
 0x324   : > { %v564_v59 = vpop.permute.xlu1 %563 }
 0x325   : > { %v566_v60 = vmul.f32 %v564_v59, %v449_v36  ;;  %v579_v61 = vmul.f32 %v578_v58, %v564_v59 }
 0x327   : > { %581 = vrot.lane.b32.xlu0 %v579_v61, %s1201_s13  ;;  %568 = vrot.lane.b32.xlu1 %v566_v60, %s1202_s14 }
 0x393   : > { %v551_v62 = vpop.permute.xlu1 %550 }
 0x394   : > { %v553_v63 = vmul.f32 %v1015_v49, %v551_v62 }
 0x396   : > { %v559_v3 = vmul.f32 %v557_v1, %v553_v63 }
 0x399   : > { %v582_v12 = vpop.permute.xlu0 %581  ;;  %v569_v13 = vpop.permute.xlu1 %568 }
 0x39a   : > { %v584_v14 = vadd.f32 %v582_v12, %v577_v2  ;;  %v571_v15 = vadd.f32 %v569_v13, %v559_v3 }
 0x39c   : > { %586 = vrot.lane.b32.xlu0 %v584_v14, %s1202_s14  ;;  %573 = vrot.lane.b32.xlu1 %v571_v15, %s1201_s13 }
 0x3a0   : > { %591 = vrot.lane.b32.xlu1 %v559_v3, %s1201_s13 }
 0x40d   :  { %442 = sbr.rel (!%p440_p4) target bundleno = 322 (0x142), region = 96 }
 0x40e   : > { %v587_v16 = vpop.permute.xlu0 %586  ;;  %v574_v17 = vpop.permute.xlu1 %573 }
 0x40f   : > { %589 = vst.msk [vmem:[#allocation5] sm:$0x3] %vm435_vm0, %v587_v16  ;;  %576 = vst.msk [vmem:[#allocation4] sm:$0x3] %vm435_vm0, %v574_v17 }
 0x412   : > { %v592_v18 = vpop.permute.xlu1 %591 }
 0x413   : > { %595 = vst.msk [vmem:[%s594_s15] sm:$0x3] %vm435_vm0, %v592_v18 }
 0x414 LB: > { %v961_v19 = vpack.c.bf16 %v1349_v9, %v1344_v8  ;;  %v1203_v20 = vmov 0.0|0.0   ;;  %v964_v4 = vpack.c.bf16 %v1359_v11, %v1354_v10  ;;  %vm1204_vm4 = vmmov 0   ;;  %v610_v0 = vld [vmem:[#allocation6] sm:$0x3]  ;;  %s604_s21 = ssub.s32 7, %s1184_s17  ;;  %s1207_s5 = smov 64   ;;  %s1184_s17 = sphi %s1415_s17, %s603_s17  }
 0x415   : > { %960 = vmatprep.subr.bf16.mxu0 %v1203_v20  ;;  %v1205_v5 = vmov 0.0   ;;  %v1206_v6 = vmov 0   ;;  %s1426_s3 = sshll.u32 %s604_s21, 1  ;;  %v611_v25 = vld [vmem:[#allocation7] sm:$0x3]  ;;  %s1208_s22 = smov 32  }
 0x416   : > { %962 = vmatpush3.bf16.msra.mxu0 %v961_v19  ;;  %919 = vmatprep.mubr.msk.f32.mxu0 %vm1204_vm4, %v1205_v5  ;;  %s608_s16 = scalar_lea.vmem [#allocation3], %s1426_s3  ;;  %s606_s18 = scalar_lea.vmem %s1483_s1, %s1426_s3  ;;  %v739_v40 = vld [vmem:[#allocation7] sm:$0x3] }
 0x417   : > { %963 = vmatprep.subr.bf16.mxu0 %v1203_v20  ;;  %1019 = vset.pattern.permute.xlu0 %v1206_v6  ;;  %v609_v7 = vld [vmem:[%s608_s16] sm:$0x3]  ;;  %s1209_s23 = smov 96   ;;  %s755_s25 = scalar_lea.vmem [#allocation17], %s1426_s3 }
 0x418   : > { %1018 = vset.pattern.permute.xlu1 %v1206_v6  ;;  %v607_v26 = vld [vmem:[%s606_s18] sm:$0x3]  ;;  %s603_s17 = sadd.s32 1, %s1184_s17  }
 0x419   : > { %v721_v34 = vsub.f32 1.0, %v607_v26  ;;  %p600_p5 = scmp.ge.s32.totalorder %s603_s17, 8  }
 0x41a   : > { %965 = vmatpush3.bf16.msra.mxu0 %v964_v4  ;;  %s1210_s26 = smov (%p600_p5), [#allocation16]   ;;  %s1211_s27 = smov (%p600_p5), [#allocation17]  }
 0x41b   :  { %s762_s6 = sshll.u32 (%p600_p5), %s1210_s26, 4  ;;  %s774_s28 = sshll.u32 (%p600_p5), %s1211_s27, 4  ;;  %s763_s6 = int_to_ptr.vmem [resolvable:$true] %s762_s6  ;;  %s1445_s28 = int_to_ptr.vmem [resolvable:$true] %s774_s28 }
 0x41c   :  { %s1116_s0 = scalar_lea.vmem (%p600_p5), %s763_s6, 256  ;;  %p1121_p7 = scmp.lt.s32.totalorder (%p600_p5), %s763_s6, %s763_s6 }
 0x41d   : > { %920 = vmatmul.mubr.msk.f32.vlgmr.msra.gmra.mrb[0].mxu0 %vm451_vm3, %v610_v0  ;;  %p1117_p6 = scmp.ne.s32.totalorder (%p600_p5), %s763_s6, %s1116_s0  ;;  %p1122_p8 = scmp.lt.s32.totalorder (%p600_p5), %s1116_s0, %s1116_s0 }
 0x41f   :  { %p1123_p9 = por (%p600_p5), %p1122_p8, %p1121_p7 }
 0x421   :  { %p1124_p10 = pnand (%p600_p5), %p1123_p9, %p1117_p6 }
 0x4f0   : > { %v682_v21 = vpop.f32.mrb[0].mxu0 }
 0x4f1   : > { %v686_v22 = vadd.f32 %v682_v21, %v609_v7  ;;  %v921_v23 = vpop.f32.mrb[1].mxu0 }
 0x4f3   : > { %1020 = vtanh.f32 %v686_v22  ;;  %v687_v27 = vsub.f32 0.0, %v686_v22 }
 0x4f5   : > { %v688_v28 = vmul.f32 1.442695, %v687_v27 }
 0x4f7   : > { %1022 = vpow2.f32 %v688_v28 }
 0x4fd   : > { %v1021_v24 = vpop.eup %1020 }
 0x4fe   : > { %700 = vrot.lane.b32.xlu0 %v1021_v24, %s1207_s5 }
 0x501   : > { %v1023_v29 = vpop.eup %1022 }
 0x502   : > { %695 = vrot.lane.b32.xlu0 %v611_v25, %s1208_s22  ;;  %v690_v30 = vadd.f32 1.0, %v1023_v29 }
 0x504   : > { %1024 = vrcp.f32 %v690_v30 }
 0x506   : > { %717 = vperm.xlu0 %1019, %v607_v26  }
 0x50e   : > { %v1025_v31 = vpop.eup %1024 }
 0x570   : > { %v701_v32 = vpop.permute.xlu0 %700 }
 0x571   : > { %v703_v33 = vmul.f32 %v1025_v31, %v701_v32 }
 0x573   : > { %705 = vrot.lane.b32.xlu1 %v703_v33, %s1208_s22 }
 0x574   : > { %v696_v35 = vpop.permute.xlu0 %695 }
 0x575   : > { %v698_v36 = vmul.f32 %v1025_v31, %v696_v35 }
 0x577   : > { %724 = vperm.xlu1 %1018, %v721_v34  }
 0x585   : > { %v718_v46 = vpop.permute.xlu0 %717 }
 0x5e5   : > { %v706_v37 = vpop.permute.xlu1 %705 }
 0x5e6   : > { %v708_v38 = vadd.f32 %v706_v37, %v698_v36 }
 0x5e8   : > { %1026 = vtanh.f32 %v708_v38  ;;  %v738_v47 = vmul.f32 %v718_v46, %v708_v38 }
 0x5f2   : > { %v1027_v39 = vpop.eup %1026 }
 0x5f3   : > { %711 = vrot.lane.b32.xlu1 %v1027_v39, %s1207_s5 }
 0x5f6   : > { %v725_v41 = vpop.permute.xlu1 %724 }
 0x5f7   : > { %v727_v42 = vmul.f32 %v725_v41, %v610_v0  ;;  %v740_v43 = vmul.f32 %v739_v40, %v725_v41 }
 0x5f9   : > { %742 = vrot.lane.b32.xlu0 %v740_v43, %s1208_s22  ;;  %729 = vrot.lane.b32.xlu1 %v727_v42, %s1209_s23 }
 0x665   : > { %v712_v44 = vpop.permute.xlu1 %711 }
 0x666   : > { %v714_v45 = vmul.f32 %v1025_v31, %v712_v44 }
 0x668   : > { %v720_v48 = vmul.f32 %v718_v46, %v714_v45 }
 0x66b   : > { %v743_v49 = vpop.permute.xlu0 %742  ;;  %v730_v50 = vpop.permute.xlu1 %729 }
 0x66c   : > { %v745_v51 = vadd.f32 %v743_v49, %v738_v47  ;;  %v732_v52 = vadd.f32 %v730_v50, %v720_v48 }
 0x66e   : > { %747 = vrot.lane.b32.xlu0 %v745_v51, %s1209_s23  ;;  %734 = vrot.lane.b32.xlu1 %v732_v52, %s1208_s22 }
 0x672   : > { %752 = vrot.lane.b32.xlu1 %v720_v48, %s1208_s22 }
 0x6df   :  { %602 = sbr.rel (!%p600_p5) target bundleno = 1044 (0x414), region = 107 }
 0x6e0   : > { %v748_v53 = vpop.permute.xlu0 %747  ;;  %v735_v54 = vpop.permute.xlu1 %734 }
 0x6e1   : > { %750 = vst.msk [vmem:[#allocation7] sm:$0x3] %vm435_vm0, %v748_v53  ;;  %737 = vst.msk [vmem:[#allocation6] sm:$0x3] %vm435_vm0, %v735_v54 }
 0x6e4   : > { %v753_v55 = vpop.permute.xlu1 %752 }
 0x6e5   : > { %756 = vst.msk [vmem:[%s755_s25] sm:$0x3] %vm435_vm0, %v753_v55 }
 0x6e6   :  { %1127 = shalt.err (!%p1124_p10)
}
 0x6e7   :  { %s1128_s24 = scalar_lea.hbm %s1490_s8, 256 }
 0x6e8   :  { %p1129_p11 = scmp.ne.s32.totalorder %s1490_s8, %s1128_s24  ;;  %p1132_p12 = scmp.lt.u32.totalorder %s1128_s24, %s1490_s8 }
 0x6ea   :  { %p1134_p13 = pnand %p1132_p12, %p1129_p11 }
 0x6ec   :  { %1137 = shalt.err (!%p1134_p13)
}
 0x6ed   :  { %768 = dma.vmem_to_hbm [thread:$0]  %s763_s6, 256, %s1490_s8, [#allocation10], %s1190_s2, %s1190_s2, %s1191_s10  }
 0x6ee   :  { %s1138_s14 = scalar_lea.vmem %s1445_s28, 256  ;;  %p1143_p1 = scmp.lt.s32.totalorder %s1445_s28, %s1445_s28 }
 0x6ef   :  { %p1139_p0 = scmp.ne.s32.totalorder %s1445_s28, %s1138_s14  ;;  %p1144_p2 = scmp.lt.s32.totalorder %s1138_s14, %s1138_s14 }
 0x6f1   :  { %p1145_p3 = por %p1144_p2, %p1143_p1 }
 0x6f3   :  { %p1146_p4 = pnand %p1145_p3, %p1139_p0 }
 0x6f5   :  { %1149 = shalt.err (!%p1146_p4)
}
 0x6f6   :  { %s1150_s21 = scalar_lea.hbm %s1491_s9, 256 }
 0x6f7   :  { %p1151_p5 = scmp.ne.s32.totalorder %s1491_s9, %s1150_s21  ;;  %p1154_p6 = scmp.lt.u32.totalorder %s1150_s21, %s1491_s9 }
 0x6f9   :  { %p1156_p7 = pnand %p1154_p6, %p1151_p5 }
 0x6fb   :  { %1159 = shalt.err (!%p1156_p7)
}
 0x6fc   :  { %780 = dma.vmem_to_hbm [thread:$0]  %s1445_s28, 256, %s1491_s9, [#allocation18], %s1190_s2, %s1190_s2, %s1191_s10  }
 0x6fd   :  { %1174 = dma.done.wait [#allocation10], 256  }
 0x6fe   :  { %1175 = vsyncadd [#allocation10], 4294967040 }
 0x6ff   :  { %1176 = dma.done.wait [#allocation18], 256  }
 0x700   :  { %1177 = vsyncadd [#allocation18], 4294967040 }
 0x701   :  { %787 = vsyncpa [#allocation9], 1 }
 0x702   :  { %788 = vsyncpa [#allocation12], 1 }
 0x703   :  { %789 = vsyncpa [#allocation15], 1 }
 0x704   :  { %790 = vsyncpa [#allocation10], 1 }
 0x705   :  { %791 = vsyncpa [#allocation18], 1 }

</bundles_post_ra>
